<compile_context>
chip_gen: v7x
topology: tpu7x:2x2x1
jax: 0.10.0
libtpu: 0.0.40
codegen_flags: <defaults>
</compile_context>

<pallas_src>
import functools

import jax
import jax.numpy as jnp
from jax.experimental import pallas as pl
from jax.experimental.pallas import tpu as pltpu


DEFAULT_TILE_B = 4096  # lanes per grid step; sweep {2048, 4096, 8192} per chip


def _round_up(n, m):
    return ((n + m - 1) // m) * m


def _choose_tile(batch, tile_b):
    """Pick the batch tile (lane count per grid step).

    - batch <= 128: a single full-array block (full-dim blocks are always legal).
    - otherwise: a multiple of 128, capped at ~half the batch so the grid has
      >= 2 steps (v7x megacore) and padding waste is bounded by one tile.
    """
    if batch <= 128:
        return batch
    half = _round_up(-(-batch // 2), 128)          # ceil(batch/2) rounded to 128
    return max(128, min(_round_up(tile_b, 128), half))


def concretenet_kernel(x_ref,
                       w1_ref, b1_ref,
                       w2_ref, b2_ref,
                       w3_ref, b3_ref,
                       w4_ref, b4_ref,
                       o_ref):
    # x_ref: [8, T] bf16    w1..w3: bf16 [out, in]    b1..b3: f32 [out, 1]
    # w4_ref: f32 [16, 1]   b4_ref: f32 [1, 1]        o_ref: [1, T] f32
    x = x_ref[...]                                                   # [8, T] bf16

    # fc1 + ReLU  (MXU bf16, f32 accumulate)
    h = jnp.dot(w1_ref[...], x, preferred_element_type=jnp.float32)
    h = jnp.maximum(h + b1_ref[...], 0.0)                            # [64, T] f32

    # fc2 + ReLU
    h = jnp.dot(w2_ref[...], h.astype(jnp.bfloat16),
                preferred_element_type=jnp.float32)
    h = jnp.maximum(h + b2_ref[...], 0.0)                            # [32, T] f32

    # fc3 + ReLU
    h = jnp.dot(w3_ref[...], h.astype(jnp.bfloat16),
                preferred_element_type=jnp.float32)
    h = jnp.maximum(h + b3_ref[...], 0.0)                            # [16, T] f32

    # fc4: M=1 matmul replaced by a VPU broadcast-multiply + sublane-sum (XLU),
    # keeping it off the MXU critical path.
    o = jnp.sum(h * w4_ref[...], axis=0, keepdims=True) + b4_ref[...]
    o_ref[...] = o.astype(o_ref.dtype)                               # [1, T]


@functools.partial(jax.jit, static_argnames=("tile_b",))
def concretenet_forward(x, params, tile_b=DEFAULT_TILE_B):
    """x: [B, 8] float32. params: PyTorch-layout w{i}: [out, in], b{i}: [out, 1].

    Returns [B, 1] float32, matching ConcreteNet.forward (bf16 MXU precision,
    f32 accumulation).
    """
    B = x.shape[0]
    tile = _choose_tile(B, tile_b)
    grid = (pl.cdiv(B, tile),)

    # Single fused transpose + bf16 cast; no host-side pad, no output slice.
    # TODO(synk): fold this transpose into the kernel (XLU vxpose on a
    # [tile, 8] block) once that lowering path is verified on all targets.
    x_t = x.T.astype(jnp.bfloat16)                                   # [8, B]

    w1 = params["w1"].astype(jnp.bfloat16)                           # [64, 8]
    w2 = params["w2"].astype(jnp.bfloat16)                           # [32, 64]
    w3 = params["w3"].astype(jnp.bfloat16)                           # [16, 32]
    w4c = params["w4"].reshape(16, 1)                                # f32 column
    b1, b2, b3, b4 = params["b1"], params["b2"], params["b3"], params["b4"]

    def resident(arr):
        # Constant index_map -> block stays in VMEM across all grid steps.
        return pl.BlockSpec(arr.shape, lambda i: (0, 0))

    in_specs = [
        pl.BlockSpec((8, tile), lambda i: (0, i)),   # x tile streams over batch
        resident(w1), resident(b1),
        resident(w2), resident(b2),
        resident(w3), resident(b3),
        resident(w4c), resident(b4),
    ]
    out_spec = pl.BlockSpec((1, tile), lambda i: (0, i))

    flops = 2 * B * (8 * 64 + 64 * 32 + 32 * 16 + 16 * 1)
    bytes_accessed = B * (8 * 2 + 4) + 8 * 1024      # bf16 x in, f32 out, params

    out_t = pl.pallas_call(
        concretenet_kernel,
        out_shape=jax.ShapeDtypeStruct((1, B), jnp.float32),
        grid=grid,
        in_specs=in_specs,
        out_specs=out_spec,
        compiler_params=pltpu.CompilerParams(
            # Batch axis is embarrassingly parallel (v7x shards it over 2 TCs).
            dimension_semantics=("parallel",),
        ),
        cost_estimate=pl.CostEstimate(
            flops=flops, transcendentals=0, bytes_accessed=bytes_accessed),
    )(x_t, w1, b1, w2, b2, w3, b3, w4c, b4)

    # [1, B] is contiguous -> reshape to [B, 1] is free.
    return out_t.reshape(B, 1)


def init_params(key):
    """PyTorch nn.Linear default init (uniform +/- 1/sqrt(fan_in)), [out, in] layout."""
    dims = [(8, 64), (64, 32), (32, 16), (16, 1)]
    params = {}
    keys = jax.random.split(key, 2 * len(dims))
    for i, (fan_in, fan_out) in enumerate(dims):
        bound = 1.0 / jnp.sqrt(jnp.float32(fan_in))
        params[f"w{i + 1}"] = jax.random.uniform(
            keys[2 * i], (fan_out, fan_in), minval=-bound, maxval=bound,
            dtype=jnp.float32)
        params[f"b{i + 1}"] = jax.random.uniform(
            keys[2 * i + 1], (fan_out, 1), minval=-bound, maxval=bound,
            dtype=jnp.float32)
    return params


def concretenet_reference_f32(x, params):
    """Pure-f32 reference (same math as the PyTorch module)."""
    h = jnp.maximum(x @ params["w1"].T + params["b1"].T, 0.0)
    h = jnp.maximum(h @ params["w2"].T + params["b2"].T, 0.0)
    h = jnp.maximum(h @ params["w3"].T + params["b3"].T, 0.0)
    return h @ params["w4"].T + params["b4"].T


def concretenet_reference_bf16(x, params):
    """Mirrors the kernel's precision: bf16 MXU inputs, f32 accumulation."""
    bf16, f32 = jnp.bfloat16, jnp.float32
    h = jnp.dot(x.astype(bf16), params["w1"].astype(bf16).T,
                preferred_element_type=f32)
    h = jnp.maximum(h + params["b1"].T, 0.0)
    h = jnp.dot(h.astype(bf16), params["w2"].astype(bf16).T,
                preferred_element_type=f32)
    h = jnp.maximum(h + params["b2"].T, 0.0)
    h = jnp.dot(h.astype(bf16), params["w3"].astype(bf16).T,
                preferred_element_type=f32)
    h = jnp.maximum(h + params["b3"].T, 0.0)
    return h @ params["w4"].T + params["b4"].T


if __name__ == "__main__":
    key = jax.random.PRNGKey(0)
    pkey, xkey, xkey2 = jax.random.split(key, 3)

    params = init_params(pkey)

    # Small smoke test (single full-array block). NOTE: at B=8 a plain XLA
    # fusion would beat any kernel launch; this is a correctness check only.
    x = jax.random.normal(xkey, (8, 8), dtype=jnp.float32)
    out = jax.block_until_ready(concretenet_forward(x, params))
    assert out.shape == (8, 1), out.shape
    assert jnp.allclose(out, concretenet_reference_bf16(x, params),
                        atol=2e-3, rtol=2e-3)
    assert jnp.allclose(out, concretenet_reference_f32(x, params),
                        atol=1e-1, rtol=1e-1)

    # Multi-tile batch: grid >= 2 (both TCs on v7x), ragged edge block.
    xb = jax.random.normal(xkey2, (2500, 8), dtype=jnp.float32)
    outb = jax.block_until_ready(concretenet_forward(xb, params))
    assert outb.shape == (2500, 1), outb.shape
    assert jnp.allclose(outb, concretenet_reference_bf16(xb, params),
                        atol=2e-3, rtol=2e-3)
    assert jnp.allclose(outb, concretenet_reference_f32(xb, params),
                        atol=1e-1, rtol=1e-1)

    print("KERNEL_OK")
</pallas_src>

<mosaic_0001>
module attributes {stable_mosaic.version = 11 : i64} {
  func.func @concretenet_kernel(%arg0: i32, %arg1: memref<8x8xbf16, #tpu.memory_space<vmem>>, %arg2: memref<64x8xbf16, #tpu.memory_space<vmem>>, %arg3: memref<64x1xf32, #tpu.memory_space<vmem>>, %arg4: memref<32x64xbf16, #tpu.memory_space<vmem>>, %arg5: memref<32x1xf32, #tpu.memory_space<vmem>>, %arg6: memref<16x32xbf16, #tpu.memory_space<vmem>>, %arg7: memref<16x1xf32, #tpu.memory_space<vmem>>, %arg8: memref<16x1xf32, #tpu.memory_space<vmem>>, %arg9: memref<1x1xf32, #tpu.memory_space<vmem>>, %arg10: memref<1x8xf32, #tpu.memory_space<vmem>>) attributes {dimension_semantics = [#tpu.dimension_semantics<parallel>], iteration_bounds = array<i64: 1>, scalar_prefetch = 0 : i64, scratch_operands = 0 : i64, tpu.core_type = #tpu.core_type<tc>, window_params = [{transform_indices = @transform_0, window_bounds = array<i64: 8, 8>}, {pipeline_mode = #tpu.pipeline_mode<synchronous>, transform_indices = @transform_1, window_bounds = array<i64: 64, 8>}, {pipeline_mode = #tpu.pipeline_mode<synchronous>, transform_indices = @transform_2, window_bounds = array<i64: 64, 1>}, {pipeline_mode = #tpu.pipeline_mode<synchronous>, transform_indices = @transform_3, window_bounds = array<i64: 32, 64>}, {pipeline_mode = #tpu.pipeline_mode<synchronous>, transform_indices = @transform_4, window_bounds = array<i64: 32, 1>}, {pipeline_mode = #tpu.pipeline_mode<synchronous>, transform_indices = @transform_5, window_bounds = array<i64: 16, 32>}, {pipeline_mode = #tpu.pipeline_mode<synchronous>, transform_indices = @transform_6, window_bounds = array<i64: 16, 1>}, {pipeline_mode = #tpu.pipeline_mode<synchronous>, transform_indices = @transform_7, window_bounds = array<i64: 16, 1>}, {pipeline_mode = #tpu.pipeline_mode<synchronous>, transform_indices = @transform_8, window_bounds = array<i64: 1, 1>}, {transform_indices = @transform_9, window_bounds = array<i64: 1, 8>}]} {
    %c0 = arith.constant 0 : index
    %c0_0 = arith.constant 0 : index
    %0 = vector.load %arg1[%c0, %c0_0] : memref<8x8xbf16, #tpu.memory_space<vmem>>, vector<8x8xbf16>
    %c0_1 = arith.constant 0 : index
    %c0_2 = arith.constant 0 : index
    %1 = vector.load %arg2[%c0_1, %c0_2] : memref<64x8xbf16, #tpu.memory_space<vmem>>, vector<64x8xbf16>
    %cst = arith.constant dense<0.000000e+00> : vector<64x8xf32>
    %2 = tpu.matmul %1, %0, %cst {dimension_numbers = #tpu.dot_dimension_numbers<[1], [0], [0], [1], [0, 0, 1, 1], [], []>} : vector<64x8xbf16>, vector<8x8xbf16>, vector<64x8xf32> -> vector<64x8xf32>
    %c0_3 = arith.constant 0 : index
    %c0_4 = arith.constant 0 : index
    %3 = vector.load %arg3[%c0_3, %c0_4] : memref<64x1xf32, #tpu.memory_space<vmem>>, vector<64x1xf32>
    %4 = vector.broadcast %3 : vector<64x1xf32> to vector<64x8xf32>
    %5 = arith.addf %2, %4 : vector<64x8xf32>
    %cst_5 = arith.constant 0.000000e+00 : f32
    %6 = vector.broadcast %cst_5 : f32 to vector<64x8xf32>
    %7 = arith.maximumf %5, %6 : vector<64x8xf32>
    %c0_6 = arith.constant 0 : index
    %c0_7 = arith.constant 0 : index
    %8 = vector.load %arg4[%c0_6, %c0_7] : memref<32x64xbf16, #tpu.memory_space<vmem>>, vector<32x64xbf16>
    %9 = arith.truncf %7 : vector<64x8xf32> to vector<64x8xbf16>
    %cst_8 = arith.constant dense<0.000000e+00> : vector<32x8xf32>
    %10 = tpu.matmul %8, %9, %cst_8 {dimension_numbers = #tpu.dot_dimension_numbers<[1], [0], [0], [1], [0, 0, 1, 1], [], []>} : vector<32x64xbf16>, vector<64x8xbf16>, vector<32x8xf32> -> vector<32x8xf32>
    %c0_9 = arith.constant 0 : index
    %c0_10 = arith.constant 0 : index
    %11 = vector.load %arg5[%c0_9, %c0_10] : memref<32x1xf32, #tpu.memory_space<vmem>>, vector<32x1xf32>
    %12 = vector.broadcast %11 : vector<32x1xf32> to vector<32x8xf32>
    %13 = arith.addf %10, %12 : vector<32x8xf32>
    %cst_11 = arith.constant 0.000000e+00 : f32
    %14 = vector.broadcast %cst_11 : f32 to vector<32x8xf32>
    %15 = arith.maximumf %13, %14 : vector<32x8xf32>
    %c0_12 = arith.constant 0 : index
    %c0_13 = arith.constant 0 : index
    %16 = vector.load %arg6[%c0_12, %c0_13] : memref<16x32xbf16, #tpu.memory_space<vmem>>, vector<16x32xbf16>
    %17 = arith.truncf %15 : vector<32x8xf32> to vector<32x8xbf16>
    %cst_14 = arith.constant dense<0.000000e+00> : vector<16x8xf32>
    %18 = tpu.matmul %16, %17, %cst_14 {dimension_numbers = #tpu.dot_dimension_numbers<[1], [0], [0], [1], [0, 0, 1, 1], [], []>} : vector<16x32xbf16>, vector<32x8xbf16>, vector<16x8xf32> -> vector<16x8xf32>
    %c0_15 = arith.constant 0 : index
    %c0_16 = arith.constant 0 : index
    %19 = vector.load %arg7[%c0_15, %c0_16] : memref<16x1xf32, #tpu.memory_space<vmem>>, vector<16x1xf32>
    %20 = vector.broadcast %19 : vector<16x1xf32> to vector<16x8xf32>
    %21 = arith.addf %18, %20 : vector<16x8xf32>
    %cst_17 = arith.constant 0.000000e+00 : f32
    %22 = vector.broadcast %cst_17 : f32 to vector<16x8xf32>
    %23 = arith.maximumf %21, %22 : vector<16x8xf32>
    %c0_18 = arith.constant 0 : index
    %c0_19 = arith.constant 0 : index
    %24 = vector.load %arg8[%c0_18, %c0_19] : memref<16x1xf32, #tpu.memory_space<vmem>>, vector<16x1xf32>
    %25 = vector.broadcast %24 : vector<16x1xf32> to vector<16x8xf32>
    %26 = arith.mulf %23, %25 : vector<16x8xf32>
    %cst_20 = arith.constant dense<0.000000e+00> : vector<8xf32>
    %27 = vector.multi_reduction <add>, %26, %cst_20 [0] : vector<16x8xf32> to vector<8xf32>
    %28 = vector.shape_cast %27 : vector<8xf32> to vector<1x8xf32>
    %c0_21 = arith.constant 0 : index
    %c0_22 = arith.constant 0 : index
    %29 = vector.load %arg9[%c0_21, %c0_22] : memref<1x1xf32, #tpu.memory_space<vmem>>, vector<1x1xf32>
    %30 = vector.broadcast %29 : vector<1x1xf32> to vector<1x8xf32>
    %31 = arith.addf %28, %30 : vector<1x8xf32>
    %c0_23 = arith.constant 0 : index
    %c0_24 = arith.constant 0 : index
    %32 = vector.load %arg10[%c0_23, %c0_24] : memref<1x8xf32, #tpu.memory_space<vmem>>, vector<1x8xf32>
    tpu.vector_store %arg10[%c0_23, %c0_24], %31 {strides = array<i32>} : memref<1x8xf32, #tpu.memory_space<vmem>>, vector<1x8xf32>,
    return
  }
  func.func @transform_0(%arg0: i32) -> (i32, i32) {
    %c0_i32 = arith.constant 0 : i32
    %c0_i32_0 = arith.constant 0 : i32
    return %c0_i32, %arg0 : i32, i32
  }
  func.func @transform_1(%arg0: i32) -> (i32, i32) {
    %c0_i32 = arith.constant 0 : i32
    %c0_i32_0 = arith.constant 0 : i32
    %c0_i32_1 = arith.constant 0 : i32
    return %c0_i32, %c0_i32_0 : i32, i32
  }
  func.func @transform_2(%arg0: i32) -> (i32, i32) {
    %c0_i32 = arith.constant 0 : i32
    %c0_i32_0 = arith.constant 0 : i32
    %c0_i32_1 = arith.constant 0 : i32
    return %c0_i32, %c0_i32_0 : i32, i32
  }
  func.func @transform_3(%arg0: i32) -> (i32, i32) {
    %c0_i32 = arith.constant 0 : i32
    %c0_i32_0 = arith.constant 0 : i32
    %c0_i32_1 = arith.constant 0 : i32
    return %c0_i32, %c0_i32_0 : i32, i32
  }
  func.func @transform_4(%arg0: i32) -> (i32, i32) {
    %c0_i32 = arith.constant 0 : i32
    %c0_i32_0 = arith.constant 0 : i32
    %c0_i32_1 = arith.constant 0 : i32
    return %c0_i32, %c0_i32_0 : i32, i32
  }
  func.func @transform_5(%arg0: i32) -> (i32, i32) {
    %c0_i32 = arith.constant 0 : i32
    %c0_i32_0 = arith.constant 0 : i32
    %c0_i32_1 = arith.constant 0 : i32
    return %c0_i32, %c0_i32_0 : i32, i32
  }
  func.func @transform_6(%arg0: i32) -> (i32, i32) {
    %c0_i32 = arith.constant 0 : i32
    %c0_i32_0 = arith.constant 0 : i32
    %c0_i32_1 = arith.constant 0 : i32
    return %c0_i32, %c0_i32_0 : i32, i32
  }
  func.func @transform_7(%arg0: i32) -> (i32, i32) {
    %c0_i32 = arith.constant 0 : i32
    %c0_i32_0 = arith.constant 0 : i32
    %c0_i32_1 = arith.constant 0 : i32
    return %c0_i32, %c0_i32_0 : i32, i32
  }
  func.func @transform_8(%arg0: i32) -> (i32, i32) {
    %c0_i32 = arith.constant 0 : i32
    %c0_i32_0 = arith.constant 0 : i32
    %c0_i32_1 = arith.constant 0 : i32
    return %c0_i32, %c0_i32_0 : i32, i32
  }
  func.func @transform_9(%arg0: i32) -> (i32, i32) {
    %c0_i32 = arith.constant 0 : i32
    %c0_i32_0 = arith.constant 0 : i32
    return %c0_i32, %arg0 : i32, i32
  }
}

</mosaic_0001>

<bundles_post_ra>
// kernel: concretenet_forward.1
= control target key start
LH: loop header
LB: loop body
LE: loop exit
PB: predicated region body
PF: predicated region fallthrough
CT: control target
= control target key end

     0   :  { %s668_s0 = inlined_call_operand.vmem [shape: bf16[8,8], index: 0, kind: input, shape index: {}]   ;;  %s669_s1 = inlined_call_operand.vmem [shape: bf16[64,8], index: 1, kind: input, shape index: {}]   ;;  %s670_s2 = inlined_call_operand.vmem [shape: f32[64,1], index: 2, kind: input, shape index: {}]   ;;  %s671_s3 = inlined_call_operand.vmem [shape: bf16[32,64], index: 3, kind: input, shape index: {}]   ;;  %s672_s4 = inlined_call_operand.vmem [shape: f32[32,1], index: 4, kind: input, shape index: {}]   ;;  %s673_s5 = inlined_call_operand.vmem [shape: bf16[16,32], index: 5, kind: input, shape index: {}]   ;;  %s674_s6 = inlined_call_operand.vmem [shape: f32[16,1], index: 6, kind: input, shape index: {}]   ;;  %s675_s7 = inlined_call_operand.vmem [shape: f32[16,1], index: 7, kind: input, shape index: {}]   ;;  %s676_s8 = inlined_call_operand.<no memory space> [shape: f32[1,1], index: 8, kind: input, shape index: {}]   ;;  %s677_s9 = inlined_call_operand.hbm [shape: f32[1,8], index: 9, kind: output, shape index: {}]  }
   0x1   :  { %v14_v0 = vstv %s676_s8 }
   0x2   :  { %15 = vst [vmem:[#allocation2] sm:$0x1] %v14_v0 }
   0x3   :  { %v36_v1 = vld [vmem:[%s668_s0] sm:$0xf]  ;;  %vm126_vm0 = vcmask 1043456   ;;  %vm113_vm1 = vcmask 64512   ;;  %v489_v4 = vld [vmem:[%s669_s1 + $0x8] sm:$0xff]   ;;  %v490_v5 = vld [vmem:[%s669_s1 + $0x10] sm:$0xff]  }
   0x4   :  { %v488_v2 = vld [vmem:[%s669_s1] sm:$0xff]   ;;  %481 = vmatprep.subr.msk.bf16.mxu0 %vm126_vm0, %v36_v1  ;;  %v128_v3 = vsel %vm126_vm0, %v36_v1, 0  ;;  %v519_v6 = vmov 0   ;;  %v47_v8 = vld [vmem:[%s670_s2 + $0x10] sm:$0xff]  ;;  %v46_v9 = vld [vmem:[%s670_s2 + $0x8] sm:$0xff] }
   0x5   :  { %452 = vmatpush3.bf16.msra.mxu0 %v128_v3  ;;  %453 = vmatprep.mubr.msk.bf16.mxu0 %vm113_vm1, %v488_v2  ;;  %v45_v7 = vld [vmem:[%s670_s2] sm:$0xff]  ;;  %v48_v10 = vld [vmem:[%s670_s2 + $0x18] sm:$0xff]  ;;  %v50_v13 = vld [vmem:[%s670_s2 + $0x28] sm:$0xff] }
   0x6   :  { %486 = vset.pattern.permute.xlu0 %v519_v6  ;;  %487 = vset.pattern.permute.xlu1 %v519_v6  ;;  %v491_v11 = vld [vmem:[%s669_s1 + $0x18] sm:$0xff]   ;;  %v49_v12 = vld [vmem:[%s670_s2 + $0x20] sm:$0xff] }
   0x7   :  { %55 = vperm.xlu0 %486, %v45_v7   ;;  %65 = vperm.xlu1 %487, %v47_v8  }
   0x8   :  { %454 = vmatmul.mubr.msk.bf16.vlgmr.msra.gmra.mrb[0].mxu0 %vm113_vm1, %v489_v4 }
   0x9   :  { %457 = vmatprep.mubr.msk.bf16.mxu0 %vm113_vm1, %v490_v5 }
   0xb   :  { %60 = vperm.xlu0 %486, %v46_v9   ;;  %70 = vperm.xlu1 %487, %v48_v10  }
   0xc   :  { %16 = vsyncpa [#allocation4], 0  ;;  %v51_v14 = vld [vmem:[%s670_s2 + $0x30] sm:$0xff]  ;;  %v52_v15 = vld [vmem:[%s670_s2 + $0x38] sm:$0xff]  ;;  %vm245_vm2 = vcmask 523264   ;;  %v520_v63 = vmov 0.0  }
   0xd   :  { %v211_v16 = vld [vmem:[%s672_s4] sm:$0xff]  ;;  %v212_v17 = vld [vmem:[%s672_s4 + $0x8] sm:$0xff]  ;;  %v213_v18 = vld [vmem:[%s672_s4 + $0x10] sm:$0xff]  ;;  %473 = vmatprep.subr.bf16.mxu0 %v520_v63  ;;  %vm521_vm3 = vmmov 0   ;;  %vm326_vm4 = vcmask 261120   ;;  %vm407_vm5 = vcmask 57344  }
   0xe   :  { %v214_v19 = vld [vmem:[%s672_s4 + $0x18] sm:$0xff]  ;;  %v309_v20 = vld [vmem:[%s674_s6] sm:$0xff]  ;;  %v310_v21 = vld [vmem:[%s674_s6 + $0x8] sm:$0xff] }
   0xf   :  { %75 = vperm.xlu0 %486, %v49_v12   ;;  %80 = vperm.xlu1 %487, %v50_v13   ;;  %v373_v22 = vld [vmem:[%s675_s7] sm:$0xff]  ;;  %v374_v23 = vld [vmem:[%s675_s7 + $0x8] sm:$0xff] }
  0x10   :  { %458 = vmatmul.mubr.msk.bf16.gmra.mrb[4].mxu0 %vm113_vm1, %v491_v11  ;;  %v396_v24 = vld [vmem:[#allocation2] sm:$0x1]  ;;  %v493_v62 = vld [vmem:[%s671_s3 + $0x8] sm:$0xff]  }
  0x11   :  { %v492_v25 = vld [vmem:[%s671_s3] sm:$0xff]   ;;  %477 = vmatprep.mubr.msk.bf16.mxu0 %vm521_vm3, %v520_v63 }
  0x12   :  { %469 = vmatprep.mubr.msk.bf16.mxu1 %vm245_vm2, %v492_v25 }
  0x13   :  { %85 = vperm.xlu0 %486, %v51_v14   ;;  %90 = vperm.xlu1 %487, %v52_v15  }
  0x17   :  { %217 = vperm.xlu0 %486, %v211_v16   ;;  %222 = vperm.xlu1 %487, %v212_v17  }
  0x1b   :  { %227 = vperm.xlu0 %486, %v213_v18   ;;  %232 = vperm.xlu1 %487, %v214_v19   ;;  %v494_v18 = vld [vmem:[%s673_s5] sm:$0xff]   ;;  %s522_s5 = smov [#allocation3]  }
  0x1c   :  { %s415_s28 = sshll.u32 %s522_s5, 4  ;;  %s416_s28 = int_to_ptr.vmem [resolvable:$true] %s415_s28 }
  0x1d   :  { %s495_s29 = scalar_lea.vmem %s416_s28, 16  ;;  %s499_s30 = scalar_lea.vmem %s416_s28, 32 }
  0x1e   :  { %p496_p0 = scmp.ne.s32.totalorder %s416_s28, %s495_s29  ;;  %p500_p1 = scmp.lt.s32.totalorder %s416_s28, %s416_s28 }
  0x1f   :  { %313 = vperm.xlu0 %486, %v309_v20   ;;  %318 = vperm.xlu1 %487, %v310_v21   ;;  %p501_p2 = scmp.lt.s32.totalorder %s499_s30, %s495_s29 }
  0x21   :  { %p502_p3 = por %p501_p2, %p500_p1 }
  0x23   :  { %377 = vperm.xlu0 %486, %v373_v22   ;;  %382 = vperm.xlu1 %487, %v374_v23   ;;  %p503_p4 = pnand %p502_p3, %p496_p0 }
  0x27   :  { %399 = vperm.xlu0 %486, %v396_v24  }
  0x86   :  { %v56_v26 = vpop.permute.xlu0 %55  ;;  %v66_v27 = vpop.permute.xlu1 %65 }
  0x8a   :  { %v61_v28 = vpop.permute.xlu0 %60  ;;  %v71_v29 = vpop.permute.xlu1 %70 }
  0x8e   :  { %v76_v33 = vpop.permute.xlu0 %75  ;;  %v81_v38 = vpop.permute.xlu1 %80 }
  0x92   :  { %v86_v45 = vpop.permute.xlu0 %85  ;;  %v91_v50 = vpop.permute.xlu1 %90 }
  0x96   :  { %v218_v0 = vpop.permute.xlu0 %217  ;;  %v223_v1 = vpop.permute.xlu1 %222 }
  0x9a   :  { %v228_v2 = vpop.permute.xlu0 %227  ;;  %v233_v6 = vpop.permute.xlu1 %232 }
  0x9e   :  { %v314_v19 = vpop.permute.xlu0 %313  ;;  %v319_v20 = vpop.permute.xlu1 %318 }
  0xdb   :  { %v455_v30 = vpop.f32.mrb[0].mxu0 }
  0xdc   :  { %v173_v31 = vadd.f32 %v455_v30, %v66_v27  ;;  %v164_v32 = vpop.f32.mrb[1].mxu0 }
  0xdd   :  { %v165_v34 = vadd.f32 %v164_v32, %v56_v26  ;;  %v456_v35 = vpop.f32.mrb[2].mxu0 }
  0xde   :  { %v176_v36 = vadd.f32 %v456_v35, %v71_v29  ;;  %v167_v37 = vpop.f32.mrb[3].mxu0  ;;  %v197_v40 = vmax.f32 %v173_v31, 0.0  ;;  %v383_v31 = vpop.permute.xlu1 %382  ;;  %v402_v35 = vlaneseq }
  0xdf   :  { %v168_v39 = vadd.f32 %v167_v37, %v61_v28  ;;  %v195_v42 = vmax.f32 %v165_v34, 0.0  ;;  %v378_v28 = vpop.permute.xlu0 %377 }
  0xe0   :  { %v198_v41 = vmax.f32 %v176_v36, 0.0 }
  0xe1   :  { %v196_v43 = vmax.f32 %v168_v39, 0.0 }
  0xe2   :  { %v208_v44 = vpack.c.bf16 %v198_v41, %v197_v40 }
  0xe3   :  { %v459_v46 = vpop.f32.mrb[4].mxu0  ;;  %v207_v47 = vpack.c.bf16 %v196_v43, %v195_v42  ;;  %v400_v43 = vpop.permute.xlu0 %399 }
  0xe4   :  { %v189_v48 = vadd.f32 %v459_v46, %v86_v45  ;;  %v180_v49 = vpop.f32.mrb[5].mxu0 }
  0xe5   :  { %v181_v51 = vadd.f32 %v180_v49, %v76_v33  ;;  %v460_v52 = vpop.f32.mrb[6].mxu0  ;;  %461 = vmatprep.subr.bf16.mxu1 %v207_v47 }
  0xe6   :  { %v192_v53 = vadd.f32 %v460_v52, %v91_v50  ;;  %v183_v54 = vpop.f32.mrb[7].mxu0  ;;  %462 = vmatpush3.bf16.msra.mxu1 %v207_v47  ;;  %v201_v56 = vmax.f32 %v189_v48, 0.0 }
  0xe7   :  { %v184_v55 = vadd.f32 %v183_v54, %v81_v38  ;;  %463 = vmatprep.subr.bf16.mxu1 %v208_v44  ;;  %v199_v58 = vmax.f32 %v181_v51, 0.0  ;;  %v403_v38 = vshrl.u32 %v402_v35, 7 }
  0xe8   :  { %v202_v57 = vmax.f32 %v192_v53, 0.0 }
  0xe9   :  { %v200_v59 = vmax.f32 %v184_v55, 0.0  ;;  %v404_v41 = vsub.s32 0, %v403_v38 }
  0xea   :  { %v210_v60 = vpack.c.bf16 %v202_v57, %v201_v56  ;;  %464 = vmatpush3.bf16.msra.mxu1 %v208_v44 }
  0xeb   :  { %v209_v61 = vpack.c.bf16 %v200_v59, %v199_v58  ;;  %v405_v45 = vrot.slane %v400_v43, %v404_v41 }
  0xed   :  { %465 = vmatprep.subr.bf16.mxu1 %v209_v61 }
  0xee   :  { %466 = vmatpush3.bf16.msra.mxu1 %v209_v61 }
  0xef   :  { %467 = vmatprep.subr.bf16.mxu1 %v210_v60 }
  0xf2   :  { %468 = vmatpush3.bf16.msra.mxu1 %v210_v60 }
  0xf5   :  { %470 = vmatmul.mubr.msk.bf16.vlgmr.msra.gmra.mrb[0].mxu1 %vm245_vm2, %v493_v62 }
 0x1c8   :  { %v471_v3 = vpop.f32.mrb[0].mxu1 }
 0x1c9   :  { %v295_v4 = vadd.f32 %v471_v3, %v228_v2  ;;  %v286_v5 = vpop.f32.mrb[1].mxu1 }
 0x1ca   :  { %v287_v7 = vadd.f32 %v286_v5, %v218_v0  ;;  %v472_v8 = vpop.f32.mrb[2].mxu1 }
 0x1cb   :  { %v298_v9 = vadd.f32 %v472_v8, %v233_v6  ;;  %v289_v10 = vpop.f32.mrb[3].mxu1  ;;  %v303_v12 = vmax.f32 %v295_v4, 0.0 }
 0x1cc   :  { %v290_v11 = vadd.f32 %v289_v10, %v223_v1  ;;  %v301_v14 = vmax.f32 %v287_v7, 0.0 }
 0x1cd   :  { %v304_v13 = vmax.f32 %v298_v9, 0.0 }
 0x1ce   :  { %v302_v15 = vmax.f32 %v290_v11, 0.0 }
 0x1cf   :  { %v308_v16 = vpack.c.bf16 %v304_v13, %v303_v12 }
 0x1d0   :  { %v307_v17 = vpack.c.bf16 %v302_v15, %v301_v14 }
 0x1d2   :  { %474 = vmatpush3.bf16.msra.mxu0 %v307_v17 }
 0x1d3   :  { %475 = vmatprep.subr.bf16.mxu0 %v520_v63 }
 0x1d6   :  { %476 = vmatpush3.bf16.msra.mxu0 %v308_v16 }
 0x1d9   :  { %478 = vmatmul.mubr.msk.bf16.vlgmr.msra.gmra.mrb[8].mxu0 %vm326_vm4, %v494_v18 }
 0x2ac   :  { %v364_v21 = vpop.f32.mrb[8].mxu0 }
 0x2ad   :  { %v365_v22 = vadd.f32 %v364_v21, %v314_v19  ;;  %v479_v23 = vpop.f32.mrb[9].mxu0 }
 0x2ae   :  { %v367_v24 = vpop.f32.mrb[10].mxu0 }
 0x2af   :  { %v371_v25 = vmax.f32 %v365_v22, 0.0  ;;  %v368_v26 = vadd.f32 %v367_v24, %v319_v20  ;;  %v480_v27 = vpop.f32.mrb[11].mxu0 }
 0x2b1   :  { %v385_v29 = vmul.f32 %v378_v28, %v371_v25  ;;  %v372_v30 = vmax.f32 %v368_v26, 0.0 }
 0x2b3   :  { %v386_v32 = vmul.f32 %v383_v31, %v372_v30  ;;  %v387_v33 = vsel %vm113_vm1, %v385_v29, 0.0 }
 0x2b5   :  { %v388_v34 = vsel %vm113_vm1, %v386_v32, 0.0 }
 0x2b6   :  { %v389_v36 = vadd.f32 %v388_v34, %v387_v33 }
 0x2b8   :  { %v390_v37 = vrot.slane %v389_v36, 4 }
 0x2ba   :  { %v391_v39 = vadd.f32 %v390_v37, %v389_v36 }
 0x2bc   :  { %v392_v40 = vrot.slane %v391_v39, 2 }
 0x2be   :  { %v393_v42 = vadd.f32 %v392_v40, %v391_v39 }
 0x2c0   :  { %v394_v44 = vrot.slane %v393_v42, 1 }
 0x2c2   :  { %v395_v46 = vadd.f32 %v394_v44, %v393_v42 }
 0x2c4   :  { %v406_v47 = vadd.f32 %v405_v45, %v395_v46 }
 0x2c6   :  { %408 = vst.msk [vmem:[#allocation3] sm:$0x1] %vm407_vm5, %v406_v47 }
 0x2c7   :  { %506 = shalt.err (!%p503_p4)
}
 0x2c8   :  { %s507_s1 = scalar_lea.hbm %s677_s9, 16 }
 0x2c9   :  { %p508_p5 = scmp.ne.s32.totalorder %s677_s9, %s507_s1  ;;  %p511_p6 = scmp.lt.u32.totalorder %s507_s1, %s677_s9 }
 0x2cb   :  { %p513_p7 = pnand %p511_p6, %p508_p5 }
 0x2cd   :  { %516 = shalt.err (!%p513_p7)
}
 0x2ce   :  { %418 = dma.vmem_to_hbm [thread:$0]  %s416_s28, 16, %s677_s9, [#allocation4]  }
 0x2cf   :  { %517 = dma.done.wait [#allocation4], 16  }
 0x2d0   :  { %518 = vsyncadd [#allocation4], 4294967280 }
 0x2d1   :  { %422 = vsyncpa [#allocation4], 1 }

</bundles_post_ra>
